<compile_context>
chip_gen: v7x
topology: tpu7x:2x2x1
jax: 0.10.0
libtpu: 0.0.40
codegen_flags: <defaults>
</compile_context>

<pallas_src>
import functools

import jax
import jax.numpy as jnp
from jax import lax
from jax.experimental import pallas as pl
from jax.experimental.pallas import tpu as pltpu

REG_MAX = 16
EPS = 1e-7
FEAT = 13                       # pred_box(5) + target_box(5) + anchor(2) + weight*fg(1)
TILE_ROWS = 2048                # rows (lanes) per grid tile; sweep 1024/2048/4096
CLIP_MAX = REG_MAX - 1 - 0.01


def _cov_terms(w, h, r):
    """Gaussian covariance terms of rotated boxes; all inputs/outputs (1, TR)."""
    a = w * w * (1.0 / 12.0)
    b = h * h * (1.0 / 12.0)
    c = jnp.cos(r)
    s = jnp.sin(r)
    c2 = c * c
    s2 = s * s
    return a * c2 + b * s2, a * s2 + b * c2, (a - b) * c * s


def _rotated_bbox_loss_kernel(pd_ref, feat_ref, iou_out_ref, dfl_out_ref,
                              *, tile_rows, total_rows):
    it = pl.program_id(0)

    @pl.when(it == 0)
    def _():
        iou_out_ref[...] = jnp.zeros_like(iou_out_ref)
        dfl_out_ref[...] = jnp.zeros_like(dfl_out_ref)

    # lane index -> global row; masks the ragged overhang of the last tile.
    col = it * tile_rows + lax.broadcasted_iota(jnp.int32, (1, tile_rows), 1)
    valid = col < total_rows                                    # (1, TR) bool

    # Lane-dense feature rows, each (1, TR) f32, sliced straight from the ref.
    px = feat_ref[0:1, :]
    py = feat_ref[1:2, :]
    pw = feat_ref[2:3, :]
    ph = feat_ref[3:4, :]
    prot = feat_ref[4:5, :]
    tx = feat_ref[5:6, :]
    ty = feat_ref[6:7, :]
    tw = feat_ref[7:8, :]
    th = feat_ref[8:9, :]
    trot = feat_ref[9:10, :]
    ax = feat_ref[10:11, :]
    ay = feat_ref[11:12, :]
    wf = feat_ref[12:13, :]                                     # target_scores.sum(-1)*fg

    # ---------------- probiou ----------------
    a1, b1, c1 = _cov_terms(pw, ph, prot)
    a2, b2, c2 = _cov_terms(tw, th, trot)

    denom = (a1 + a2) * (b1 + b2) - (c1 + c2) ** 2
    inv_denom = pl.reciprocal(denom + EPS, approx=True)
    dy = py - ty                                                # y1 - y2
    dx = px - tx                                                # x1 - x2
    t1 = ((a1 + a2) * dy * dy + (b1 + b2) * dx * dx) * inv_denom * 0.25
    t2 = ((c1 + c2) * (tx - px) * dy) * inv_denom * 0.5
    det1 = jnp.maximum(a1 * b1 - c1 * c1, 0.0)
    det2 = jnp.maximum(a2 * b2 - c2 * c2, 0.0)
    t3 = jnp.log(denom / (4.0 * jnp.sqrt(det1 * det2) + EPS) + EPS) * 0.5
    bd = jnp.clip(t1 + t2 + t3, EPS, 100.0)
    hd = jnp.sqrt(1.0 - jnp.exp(-bd) + EPS)                     # (1, TR); iou = 1 - hd

    # ---------------- DFL ----------------
    # target_ltrb = bbox2dist(anchor, xywh2xyxy(target_bboxes[..., :4]), reg_max - 1)
    halfw = tw * 0.5
    halfh = th * 0.5
    sides = (
        jnp.clip(ax - (tx - halfw), 0.0, CLIP_MAX),             # l
        jnp.clip(ay - (ty - halfh), 0.0, CLIP_MAX),             # t
        jnp.clip((tx + halfw) - ax, 0.0, CLIP_MAX),             # r
        jnp.clip((ty + halfh) - ay, 0.0, CLIP_MAX),             # b
    )

    # hoisted sublane iota over the 16 DFL bins
    iota_f = lax.broadcasted_iota(jnp.int32, (REG_MAX, tile_rows), 0).astype(jnp.float32)

    dfl_acc = jnp.zeros((1, tile_rows), jnp.float32)
    for k in range(4):
        pk = pd_ref[k * REG_MAX:(k + 1) * REG_MAX, :].astype(jnp.float32)   # (16, TR)
        m = jnp.max(pk, axis=0, keepdims=True)                              # (1, TR)
        lse = m + jnp.log(jnp.sum(jnp.exp(pk - m), axis=0, keepdims=True))
        # tent weights == wl at floor(t), wr at floor(t)+1, 0 elsewhere (wl + wr == 1)
        sel = jnp.maximum(0.0, 1.0 - jnp.abs(sides[k] - iota_f))            # (16, TR)
        dfl_acc = dfl_acc + (lse - jnp.sum(sel * pk, axis=0, keepdims=True))
    dfl = dfl_acc * 0.25                                                    # mean over 4 sides

    # Vector accumulation into the resident output blocks (no per-step tree reduce).
    # SELECT (not multiply) so garbage NaN/Inf in overhang lanes is dropped.
    iou_out_ref[...] += jnp.where(valid, hd * wf, 0.0)
    dfl_out_ref[...] += jnp.where(valid, dfl * wf, 0.0)


def rotated_bbox_loss(pred_dist, pred_bboxes, anchor_points, target_bboxes,
                      target_scores, target_scores_sum, fg_mask,
                      *, tile_rows=TILE_ROWS):
    """Pallas implementation of RotatedBboxLoss.forward (reg_max=16).

    pred_dist:      (B, N, 4*reg_max)
    pred_bboxes:    (B, N, 5)   rotated boxes (x, y, w, h, r)
    anchor_points:  (N, 2)
    target_bboxes:  (B, N, 5)
    target_scores:  (B, N, NC)
    target_scores_sum: scalar
    fg_mask:        (B, N) bool
    returns (loss_iou, loss_dfl) scalars.
    """
    B, N, _ = pred_bboxes.shape
    R = B * N

    # pred_dist transposed so rows map to lanes; streamed in its NATIVE dtype.
    pd = pred_dist.reshape(R, 4 * REG_MAX).T                    # (64, R)

    # Packed lane-dense feature slab (FEAT, R) f32:
    #   [pred_box(5) | target_box(5) | anchor(2) | weight*fg(1)]
    wf = (target_scores.astype(jnp.float32).sum(-1)
          * fg_mask.astype(jnp.float32)).reshape(1, R)
    anc = jnp.broadcast_to(anchor_points.astype(jnp.float32)[None],
                           (B, N, 2)).reshape(R, 2).T           # (2, R)
    feat = jnp.concatenate([
        pred_bboxes.astype(jnp.float32).reshape(R, 5).T,
        target_bboxes.astype(jnp.float32).reshape(R, 5).T,
        anc,
        wf,
    ], axis=0)                                                  # (FEAT, R)

    # Tile along lanes: either the whole array (any R) or a 128-multiple tile.
    if R <= tile_rows:
        tr = R
    else:
        tr = max(128, (tile_rows // 128) * 128)
    num_tiles = -(-R // tr)

    kernel = functools.partial(_rotated_bbox_loss_kernel,
                               tile_rows=tr, total_rows=R)

    iou_slab, dfl_slab = pl.pallas_call(
        kernel,
        out_shape=(jax.ShapeDtypeStruct((1, tr), jnp.float32),
                   jax.ShapeDtypeStruct((1, tr), jnp.float32)),
        grid_spec=pltpu.PrefetchScalarGridSpec(
            num_scalar_prefetch=0,
            grid=(num_tiles,),
            in_specs=[
                pl.BlockSpec((4 * REG_MAX, tr), lambda i: (0, i)),
                pl.BlockSpec((FEAT, tr), lambda i: (0, i)),
            ],
            out_specs=(
                pl.BlockSpec((1, tr), lambda i: (0, 0)),
                pl.BlockSpec((1, tr), lambda i: (0, 0)),
            ),
        ),
        compiler_params=pltpu.CompilerParams(
            dimension_semantics=("arbitrary",)),
    )(pd, feat)

    tss = jnp.asarray(target_scores_sum, jnp.float32)
    loss_iou = jnp.sum(iou_slab) / tss
    loss_dfl = jnp.sum(dfl_slab) / tss
    return loss_iou, loss_dfl


# ------------------------ pure-JAX reference (for sanity check) ------------------------
def _reference(pred_dist, pred_bboxes, anchor_points, target_bboxes,
               target_scores, target_scores_sum, fg_mask):
    B, N, _ = pred_bboxes.shape
    fg = fg_mask.astype(jnp.float32)[..., None]                          # (B,N,1)
    weight = target_scores.sum(-1, keepdims=True)                        # (B,N,1)

    def cov(box):
        a = box[..., 2:3] ** 2 / 12.0
        b = box[..., 3:4] ** 2 / 12.0
        c = jnp.cos(box[..., 4:5])
        s = jnp.sin(box[..., 4:5])
        return a * c * c + b * s * s, a * s * s + b * c * c, (a - b) * c * s

    x1, y1 = pred_bboxes[..., 0:1], pred_bboxes[..., 1:2]
    x2, y2 = target_bboxes[..., 0:1], target_bboxes[..., 1:2]
    a1, b1, c1 = cov(pred_bboxes)
    a2, b2, c2 = cov(target_bboxes)
    denom = (a1 + a2) * (b1 + b2) - (c1 + c2) ** 2
    t1 = ((a1 + a2) * (y1 - y2) ** 2 + (b1 + b2) * (x1 - x2) ** 2) / (denom + EPS) * 0.25
    t2 = ((c1 + c2) * (x2 - x1) * (y1 - y2)) / (denom + EPS) * 0.5
    t3 = jnp.log(denom / (4 * jnp.sqrt(jnp.maximum(a1 * b1 - c1 ** 2, 0)
                                       * jnp.maximum(a2 * b2 - c2 ** 2, 0)) + EPS) + EPS) * 0.5
    bd = jnp.clip(t1 + t2 + t3, EPS, 100.0)
    hd = jnp.sqrt(1.0 - jnp.exp(-bd) + EPS)
    loss_iou = jnp.sum(hd * weight * fg) / target_scores_sum

    cxcy, wh = target_bboxes[..., 0:2], target_bboxes[..., 2:4]
    ltrb = jnp.concatenate([anchor_points[None] - (cxcy - wh / 2),
                            (cxcy + wh / 2) - anchor_points[None]], -1)
    ltrb = jnp.clip(ltrb, 0.0, REG_MAX - 1 - 0.01)
    tl = jnp.floor(ltrb)
    wl = tl + 1.0 - ltrb
    wr = 1.0 - wl
    pd = pred_dist.reshape(B, N, 4, REG_MAX)
    logz = jax.scipy.special.logsumexp(pd, axis=-1)
    tl_i = tl.astype(jnp.int32)
    ce_tl = logz - jnp.take_along_axis(pd, tl_i[..., None], -1)[..., 0]
    ce_tr = logz - jnp.take_along_axis(pd, tl_i[..., None] + 1, -1)[..., 0]
    dfl = jnp.mean(ce_tl * wl + ce_tr * wr, -1, keepdims=True)
    loss_dfl = jnp.sum(dfl * weight * fg) / target_scores_sum
    return loss_iou, loss_dfl


if __name__ == "__main__":
    def make_inputs(key, B, N, NC):
        ks = jax.random.split(key, 6)
        pred_dist = jax.random.normal(ks[0], (B, N, 4 * REG_MAX), jnp.float32)
        anchor_points = jax.random.uniform(ks[1], (N, 2), jnp.float32, 0.0, 16.0)

        def make_rbox(k):
            kxy, kwh, kr = jax.random.split(k, 3)
            xy = jax.random.uniform(kxy, (B, N, 2), jnp.float32, 0.0, 16.0)
            wh = jax.random.uniform(kwh, (B, N, 2), jnp.float32, 1.0, 4.0)
            r = jax.random.uniform(kr, (B, N, 1), jnp.float32, -0.78, 0.78)
            return jnp.concatenate([xy, wh, r], -1)

        pred_bboxes = make_rbox(ks[2])
        target_bboxes = make_rbox(ks[3])
        target_scores = jax.random.uniform(ks[4], (B, N, NC), jnp.float32)
        fg_mask = jax.random.bernoulli(ks[5], 0.5, (B, N))
        target_scores_sum = jnp.maximum(target_scores.sum(), 1.0)
        return (pred_dist, pred_bboxes, anchor_points, target_bboxes,
                target_scores, target_scores_sum, fg_mask)

    fn = jax.jit(rotated_bbox_loss, static_argnames=("tile_rows",))

    # Case 1: small shapes -> single tile (tr == R == 128).
    args = make_inputs(jax.random.PRNGKey(0), 2, 64, 8)
    loss_iou, loss_dfl = fn(*args)
    jax.block_until_ready((loss_iou, loss_dfl))
    ref_iou, ref_dfl = _reference(*args)
    assert jnp.isfinite(loss_iou) and jnp.isfinite(loss_dfl)
    assert jnp.allclose(loss_iou, ref_iou, rtol=5e-3, atol=5e-4), (loss_iou, ref_iou)
    assert jnp.allclose(loss_dfl, ref_dfl, rtol=5e-3, atol=5e-4), (loss_dfl, ref_dfl)

    # Case 2: ragged multi-tile path (R = 1040, tile_rows = 512 -> 3 tiles, last tile
    # overhangs and is neutralized by the in-kernel lane mask).
    args2 = make_inputs(jax.random.PRNGKey(1), 2, 520, 8)
    loss_iou2, loss_dfl2 = fn(*args2, tile_rows=512)
    jax.block_until_ready((loss_iou2, loss_dfl2))
    ref_iou2, ref_dfl2 = _reference(*args2)
    assert jnp.isfinite(loss_iou2) and jnp.isfinite(loss_dfl2)
    assert jnp.allclose(loss_iou2, ref_iou2, rtol=5e-3, atol=5e-4), (loss_iou2, ref_iou2)
    assert jnp.allclose(loss_dfl2, ref_dfl2, rtol=5e-3, atol=5e-4), (loss_dfl2, ref_dfl2)

    print("KERNEL_OK")
</pallas_src>

<mosaic_0001>
module attributes {stable_mosaic.version = 11 : i64} {
  func.func @_rotated_bbox_loss_kernel(%arg0: i32, %arg1: memref<64x128xf32, #tpu.memory_space<vmem>>, %arg2: memref<13x128xf32, #tpu.memory_space<vmem>>, %arg3: memref<1x128xf32, #tpu.memory_space<vmem>>, %arg4: memref<1x128xf32, #tpu.memory_space<vmem>>) attributes {dimension_semantics = [#tpu.dimension_semantics<arbitrary>], iteration_bounds = array<i64: 1>, scalar_prefetch = 0 : i64, scratch_operands = 0 : i64, tpu.core_type = #tpu.core_type<tc>, window_params = [{transform_indices = @transform_0, window_bounds = array<i64: 64, 128>}, {transform_indices = @transform_1, window_bounds = array<i64: 13, 128>}, {pipeline_mode = #tpu.pipeline_mode<synchronous>, transform_indices = @transform_2, window_bounds = array<i64: 1, 128>}, {pipeline_mode = #tpu.pipeline_mode<synchronous>, transform_indices = @transform_3, window_bounds = array<i64: 1, 128>}]} {
    %c0_i32 = arith.constant 0 : i32
    %0 = arith.cmpi eq, %arg0, %c0_i32 : i32
    %1 = arith.extui %0 : i1 to i32
    %c0_i32_0 = arith.constant 0 : i32
    %2 = arith.cmpi ne, %1, %c0_i32_0 : i32
    scf.if %2 {
      %cst_79 = arith.constant 0.000000e+00 : f32
      %257 = vector.broadcast %cst_79 : f32 to vector<1x128xf32>
      %c0_80 = arith.constant 0 : index
      %c0_81 = arith.constant 0 : index
      %258 = vector.load %arg3[%c0_80, %c0_81] : memref<1x128xf32, #tpu.memory_space<vmem>>, vector<1x128xf32>
      tpu.vector_store %arg3[%c0_80, %c0_81], %257 {strides = array<i32>} : memref<1x128xf32, #tpu.memory_space<vmem>>, vector<1x128xf32>,
      %cst_82 = arith.constant 0.000000e+00 : f32
      %259 = vector.broadcast %cst_82 : f32 to vector<1x128xf32>
      %c0_83 = arith.constant 0 : index
      %c0_84 = arith.constant 0 : index
      %260 = vector.load %arg4[%c0_83, %c0_84] : memref<1x128xf32, #tpu.memory_space<vmem>>, vector<1x128xf32>
      tpu.vector_store %arg4[%c0_83, %c0_84], %259 {strides = array<i32>} : memref<1x128xf32, #tpu.memory_space<vmem>>, vector<1x128xf32>,
    } else {
    }
    %c128_i32 = arith.constant 128 : i32
    %3 = arith.muli %arg0, %c128_i32 : i32
    %4 = tpu.iota {dimensions = array<i32: 1>} : vector<1x128xi32>
    %5 = vector.broadcast %3 : i32 to vector<1x128xi32>
    %6 = arith.addi %5, %4 : vector<1x128xi32>
    %c128_i32_1 = arith.constant 128 : i32
    %7 = vector.broadcast %c128_i32_1 : i32 to vector<1x128xi32>
    %8 = arith.cmpi slt, %6, %7 : vector<1x128xi32>
    %c0 = arith.constant 0 : index
    %c0_2 = arith.constant 0 : index
    %9 = vector.load %arg2[%c0, %c0_2] : memref<13x128xf32, #tpu.memory_space<vmem>>, vector<1x128xf32>
    %c1 = arith.constant 1 : index
    %c0_3 = arith.constant 0 : index
    %10 = vector.load %arg2[%c1, %c0_3] : memref<13x128xf32, #tpu.memory_space<vmem>>, vector<1x128xf32>
    %c2 = arith.constant 2 : index
    %c0_4 = arith.constant 0 : index
    %11 = vector.load %arg2[%c2, %c0_4] : memref<13x128xf32, #tpu.memory_space<vmem>>, vector<1x128xf32>
    %c3 = arith.constant 3 : index
    %c0_5 = arith.constant 0 : index
    %12 = vector.load %arg2[%c3, %c0_5] : memref<13x128xf32, #tpu.memory_space<vmem>>, vector<1x128xf32>
    %c4 = arith.constant 4 : index
    %c0_6 = arith.constant 0 : index
    %13 = vector.load %arg2[%c4, %c0_6] : memref<13x128xf32, #tpu.memory_space<vmem>>, vector<1x128xf32>
    %c5 = arith.constant 5 : index
    %c0_7 = arith.constant 0 : index
    %14 = vector.load %arg2[%c5, %c0_7] : memref<13x128xf32, #tpu.memory_space<vmem>>, vector<1x128xf32>
    %c6 = arith.constant 6 : index
    %c0_8 = arith.constant 0 : index
    %15 = vector.load %arg2[%c6, %c0_8] : memref<13x128xf32, #tpu.memory_space<vmem>>, vector<1x128xf32>
    %c7 = arith.constant 7 : index
    %c0_9 = arith.constant 0 : index
    %16 = vector.load %arg2[%c7, %c0_9] : memref<13x128xf32, #tpu.memory_space<vmem>>, vector<1x128xf32>
    %c8 = arith.constant 8 : index
    %c0_10 = arith.constant 0 : index
    %17 = vector.load %arg2[%c8, %c0_10] : memref<13x128xf32, #tpu.memory_space<vmem>>, vector<1x128xf32>
    %c9 = arith.constant 9 : index
    %c0_11 = arith.constant 0 : index
    %18 = vector.load %arg2[%c9, %c0_11] : memref<13x128xf32, #tpu.memory_space<vmem>>, vector<1x128xf32>
    %c10 = arith.constant 10 : index
    %c0_12 = arith.constant 0 : index
    %19 = vector.load %arg2[%c10, %c0_12] : memref<13x128xf32, #tpu.memory_space<vmem>>, vector<1x128xf32>
    %c11 = arith.constant 11 : index
    %c0_13 = arith.constant 0 : index
    %20 = vector.load %arg2[%c11, %c0_13] : memref<13x128xf32, #tpu.memory_space<vmem>>, vector<1x128xf32>
    %c12 = arith.constant 12 : index
    %c0_14 = arith.constant 0 : index
    %21 = vector.load %arg2[%c12, %c0_14] : memref<13x128xf32, #tpu.memory_space<vmem>>, vector<1x128xf32>
    %22 = arith.mulf %11, %11 : vector<1x128xf32>
    %cst = arith.constant 0.0833333358 : f32
    %23 = vector.broadcast %cst : f32 to vector<1x128xf32>
    %24 = arith.mulf %22, %23 : vector<1x128xf32>
    %25 = arith.mulf %12, %12 : vector<1x128xf32>
    %cst_15 = arith.constant 0.0833333358 : f32
    %26 = vector.broadcast %cst_15 : f32 to vector<1x128xf32>
    %27 = arith.mulf %25, %26 : vector<1x128xf32>
    %28 = math.cos %13 : vector<1x128xf32>
    %29 = math.sin %13 : vector<1x128xf32>
    %30 = arith.mulf %28, %28 : vector<1x128xf32>
    %31 = arith.mulf %29, %29 : vector<1x128xf32>
    %32 = arith.mulf %24, %30 : vector<1x128xf32>
    %33 = arith.mulf %27, %31 : vector<1x128xf32>
    %34 = arith.addf %32, %33 : vector<1x128xf32>
    %35 = arith.mulf %24, %31 : vector<1x128xf32>
    %36 = arith.mulf %27, %30 : vector<1x128xf32>
    %37 = arith.addf %35, %36 : vector<1x128xf32>
    %38 = arith.subf %24, %27 : vector<1x128xf32>
    %39 = arith.mulf %38, %28 : vector<1x128xf32>
    %40 = arith.mulf %39, %29 : vector<1x128xf32>
    %41 = arith.mulf %16, %16 : vector<1x128xf32>
    %cst_16 = arith.constant 0.0833333358 : f32
    %42 = vector.broadcast %cst_16 : f32 to vector<1x128xf32>
    %43 = arith.mulf %41, %42 : vector<1x128xf32>
    %44 = arith.mulf %17, %17 : vector<1x128xf32>
    %cst_17 = arith.constant 0.0833333358 : f32
    %45 = vector.broadcast %cst_17 : f32 to vector<1x128xf32>
    %46 = arith.mulf %44, %45 : vector<1x128xf32>
    %47 = math.cos %18 : vector<1x128xf32>
    %48 = math.sin %18 : vector<1x128xf32>
    %49 = arith.mulf %47, %47 : vector<1x128xf32>
    %50 = arith.mulf %48, %48 : vector<1x128xf32>
    %51 = arith.mulf %43, %49 : vector<1x128xf32>
    %52 = arith.mulf %46, %50 : vector<1x128xf32>
    %53 = arith.addf %51, %52 : vector<1x128xf32>
    %54 = arith.mulf %43, %50 : vector<1x128xf32>
    %55 = arith.mulf %46, %49 : vector<1x128xf32>
    %56 = arith.addf %54, %55 : vector<1x128xf32>
    %57 = arith.subf %43, %46 : vector<1x128xf32>
    %58 = arith.mulf %57, %47 : vector<1x128xf32>
    %59 = arith.mulf %58, %48 : vector<1x128xf32>
    %60 = arith.addf %34, %53 : vector<1x128xf32>
    %61 = arith.addf %37, %56 : vector<1x128xf32>
    %62 = arith.mulf %60, %61 : vector<1x128xf32>
    %63 = arith.addf %40, %59 : vector<1x128xf32>
    %64 = arith.mulf %63, %63 : vector<1x128xf32>
    %65 = arith.subf %62, %64 : vector<1x128xf32>
    %cst_18 = arith.constant 1.000000e-07 : f32
    %66 = vector.broadcast %cst_18 : f32 to vector<1x128xf32>
    %67 = arith.addf %65, %66 : vector<1x128xf32>
    %68 = tpu.reciprocal %67 {approx = true} : vector<1x128xf32> -> vector<1x128xf32>
    %69 = arith.subf %10, %15 : vector<1x128xf32>
    %70 = arith.subf %9, %14 : vector<1x128xf32>
    %71 = arith.addf %34, %53 : vector<1x128xf32>
    %72 = arith.mulf %71, %69 : vector<1x128xf32>
    %73 = arith.mulf %72, %69 : vector<1x128xf32>
    %74 = arith.addf %37, %56 : vector<1x128xf32>
    %75 = arith.mulf %74, %70 : vector<1x128xf32>
    %76 = arith.mulf %75, %70 : vector<1x128xf32>
    %77 = arith.addf %73, %76 : vector<1x128xf32>
    %78 = arith.mulf %77, %68 : vector<1x128xf32>
    %cst_19 = arith.constant 2.500000e-01 : f32
    %79 = vector.broadcast %cst_19 : f32 to vector<1x128xf32>
    %80 = arith.mulf %78, %79 : vector<1x128xf32>
    %81 = arith.addf %40, %59 : vector<1x128xf32>
    %82 = arith.subf %14, %9 : vector<1x128xf32>
    %83 = arith.mulf %81, %82 : vector<1x128xf32>
    %84 = arith.mulf %83, %69 : vector<1x128xf32>
    %85 = arith.mulf %84, %68 : vector<1x128xf32>
    %cst_20 = arith.constant 5.000000e-01 : f32
    %86 = vector.broadcast %cst_20 : f32 to vector<1x128xf32>
    %87 = arith.mulf %85, %86 : vector<1x128xf32>
    %88 = arith.mulf %34, %37 : vector<1x128xf32>
    %89 = arith.mulf %40, %40 : vector<1x128xf32>
    %90 = arith.subf %88, %89 : vector<1x128xf32>
    %cst_21 = arith.constant 0.000000e+00 : f32
    %91 = vector.broadcast %cst_21 : f32 to vector<1x128xf32>
    %92 = arith.maximumf %90, %91 : vector<1x128xf32>
    %93 = arith.mulf %53, %56 : vector<1x128xf32>
    %94 = arith.mulf %59, %59 : vector<1x128xf32>
    %95 = arith.subf %93, %94 : vector<1x128xf32>
    %cst_22 = arith.constant 0.000000e+00 : f32
    %96 = vector.broadcast %cst_22 : f32 to vector<1x128xf32>
    %97 = arith.maximumf %95, %96 : vector<1x128xf32>
    %98 = arith.mulf %92, %97 : vector<1x128xf32>
    %99 = math.sqrt %98 : vector<1x128xf32>
    %cst_23 = arith.constant 4.000000e+00 : f32
    %100 = vector.broadcast %cst_23 : f32 to vector<1x128xf32>
    %101 = arith.mulf %100, %99 : vector<1x128xf32>
    %cst_24 = arith.constant 1.000000e-07 : f32
    %102 = vector.broadcast %cst_24 : f32 to vector<1x128xf32>
    %103 = arith.addf %101, %102 : vector<1x128xf32>
    %104 = arith.divf %65, %103 : vector<1x128xf32>
    %cst_25 = arith.constant 1.000000e-07 : f32
    %105 = vector.broadcast %cst_25 : f32 to vector<1x128xf32>
    %106 = arith.addf %104, %105 : vector<1x128xf32>
    %107 = math.log %106 : vector<1x128xf32>
    %cst_26 = arith.constant 5.000000e-01 : f32
    %108 = vector.broadcast %cst_26 : f32 to vector<1x128xf32>
    %109 = arith.mulf %107, %108 : vector<1x128xf32>
    %110 = arith.addf %80, %87 : vector<1x128xf32>
    %111 = arith.addf %110, %109 : vector<1x128xf32>
    %cst_27 = arith.constant 1.000000e-07 : f32
    %cst_28 = arith.constant 1.000000e+02 : f32
    %112 = vector.broadcast %cst_27 : f32 to vector<1x128xf32>
    %113 = arith.maximumf %112, %111 : vector<1x128xf32>
    %114 = vector.broadcast %cst_28 : f32 to vector<1x128xf32>
    %115 = arith.minimumf %114, %113 : vector<1x128xf32>
    %cst_29 = arith.constant 0.000000e+00 : f32
    %116 = vector.broadcast %cst_29 : f32 to vector<1x128xf32>
    %117 = arith.subf %116, %115 : vector<1x128xf32>
    %118 = math.exp %117 : vector<1x128xf32>
    %cst_30 = arith.constant 1.000000e+00 : f32
    %119 = vector.broadcast %cst_30 : f32 to vector<1x128xf32>
    %120 = arith.subf %119, %118 : vector<1x128xf32>
    %cst_31 = arith.constant 1.000000e-07 : f32
    %121 = vector.broadcast %cst_31 : f32 to vector<1x128xf32>
    %122 = arith.addf %120, %121 : vector<1x128xf32>
    %123 = math.sqrt %122 : vector<1x128xf32>
    %cst_32 = arith.constant 5.000000e-01 : f32
    %124 = vector.broadcast %cst_32 : f32 to vector<1x128xf32>
    %125 = arith.mulf %16, %124 : vector<1x128xf32>
    %cst_33 = arith.constant 5.000000e-01 : f32
    %126 = vector.broadcast %cst_33 : f32 to vector<1x128xf32>
    %127 = arith.mulf %17, %126 : vector<1x128xf32>
    %128 = arith.subf %14, %125 : vector<1x128xf32>
    %129 = arith.subf %19, %128 : vector<1x128xf32>
    %cst_34 = arith.constant 0.000000e+00 : f32
    %cst_35 = arith.constant 1.499000e+01 : f32
    %130 = vector.broadcast %cst_34 : f32 to vector<1x128xf32>
    %131 = arith.maximumf %130, %129 : vector<1x128xf32>
    %132 = vector.broadcast %cst_35 : f32 to vector<1x128xf32>
    %133 = arith.minimumf %132, %131 : vector<1x128xf32>
    %134 = arith.subf %15, %127 : vector<1x128xf32>
    %135 = arith.subf %20, %134 : vector<1x128xf32>
    %cst_36 = arith.constant 0.000000e+00 : f32
    %cst_37 = arith.constant 1.499000e+01 : f32
    %136 = vector.broadcast %cst_36 : f32 to vector<1x128xf32>
    %137 = arith.maximumf %136, %135 : vector<1x128xf32>
    %138 = vector.broadcast %cst_37 : f32 to vector<1x128xf32>
    %139 = arith.minimumf %138, %137 : vector<1x128xf32>
    %140 = arith.addf %14, %125 : vector<1x128xf32>
    %141 = arith.subf %140, %19 : vector<1x128xf32>
    %cst_38 = arith.constant 0.000000e+00 : f32
    %cst_39 = arith.constant 1.499000e+01 : f32
    %142 = vector.broadcast %cst_38 : f32 to vector<1x128xf32>
    %143 = arith.maximumf %142, %141 : vector<1x128xf32>
    %144 = vector.broadcast %cst_39 : f32 to vector<1x128xf32>
    %145 = arith.minimumf %144, %143 : vector<1x128xf32>
    %146 = arith.addf %15, %127 : vector<1x128xf32>
    %147 = arith.subf %146, %20 : vector<1x128xf32>
    %cst_40 = arith.constant 0.000000e+00 : f32
    %cst_41 = arith.constant 1.499000e+01 : f32
    %148 = vector.broadcast %cst_40 : f32 to vector<1x128xf32>
    %149 = arith.maximumf %148, %147 : vector<1x128xf32>
    %150 = vector.broadcast %cst_41 : f32 to vector<1x128xf32>
    %151 = arith.minimumf %150, %149 : vector<1x128xf32>
    %152 = tpu.iota {dimensions = array<i32: 0>} : vector<16x128xi32>
    %153 = arith.sitofp %152 : vector<16x128xi32> to vector<16x128xf32>
    %cst_42 = arith.constant 0.000000e+00 : f32
    %154 = vector.broadcast %cst_42 : f32 to vector<1x128xf32>
    %c0_43 = arith.constant 0 : index
    %c0_44 = arith.constant 0 : index
    %155 = vector.load %arg1[%c0_43, %c0_44] : memref<64x128xf32, #tpu.memory_space<vmem>>, vector<16x128xf32>
    %cst_45 = arith.constant dense<0xFF800000> : vector<128xf32>
    %156 = vector.multi_reduction <maximumf>, %155, %cst_45 [0] : vector<16x128xf32> to vector<128xf32>
    %157 = vector.shape_cast %156 : vector<128xf32> to vector<1x128xf32>
    %158 = vector.broadcast %157 : vector<1x128xf32> to vector<16x128xf32>
    %159 = arith.subf %155, %158 : vector<16x128xf32>
    %160 = math.exp %159 : vector<16x128xf32>
    %cst_46 = arith.constant dense<0.000000e+00> : vector<128xf32>
    %161 = vector.multi_reduction <add>, %160, %cst_46 [0] : vector<16x128xf32> to vector<128xf32>
    %162 = vector.shape_cast %161 : vector<128xf32> to vector<1x128xf32>
    %163 = math.log %162 : vector<1x128xf32>
    %164 = arith.addf %157, %163 : vector<1x128xf32>
    %165 = vector.broadcast %133 : vector<1x128xf32> to vector<16x128xf32>
    %166 = arith.subf %165, %153 : vector<16x128xf32>
    %167 = math.absf %166 : vector<16x128xf32>
    %cst_47 = arith.constant 1.000000e+00 : f32
    %168 = vector.broadcast %cst_47 : f32 to vector<16x128xf32>
    %169 = arith.subf %168, %167 : vector<16x128xf32>
    %cst_48 = arith.constant 0.000000e+00 : f32
    %170 = vector.broadcast %cst_48 : f32 to vector<16x128xf32>
    %171 = arith.maximumf %170, %169 : vector<16x128xf32>
    %172 = arith.mulf %171, %155 : vector<16x128xf32>
    %cst_49 = arith.constant dense<0.000000e+00> : vector<128xf32>
    %173 = vector.multi_reduction <add>, %172, %cst_49 [0] : vector<16x128xf32> to vector<128xf32>
    %174 = vector.shape_cast %173 : vector<128xf32> to vector<1x128xf32>
    %175 = arith.subf %164, %174 : vector<1x128xf32>
    %176 = arith.addf %154, %175 : vector<1x128xf32>
    %c16 = arith.constant 16 : index
    %c0_50 = arith.constant 0 : index
    %177 = vector.load %arg1[%c16, %c0_50] : memref<64x128xf32, #tpu.memory_space<vmem>>, vector<16x128xf32>
    %cst_51 = arith.constant dense<0xFF800000> : vector<128xf32>
    %178 = vector.multi_reduction <maximumf>, %177, %cst_51 [0] : vector<16x128xf32> to vector<128xf32>
    %179 = vector.shape_cast %178 : vector<128xf32> to vector<1x128xf32>
    %180 = vector.broadcast %179 : vector<1x128xf32> to vector<16x128xf32>
    %181 = arith.subf %177, %180 : vector<16x128xf32>
    %182 = math.exp %181 : vector<16x128xf32>
    %cst_52 = arith.constant dense<0.000000e+00> : vector<128xf32>
    %183 = vector.multi_reduction <add>, %182, %cst_52 [0] : vector<16x128xf32> to vector<128xf32>
    %184 = vector.shape_cast %183 : vector<128xf32> to vector<1x128xf32>
    %185 = math.log %184 : vector<1x128xf32>
    %186 = arith.addf %179, %185 : vector<1x128xf32>
    %187 = vector.broadcast %139 : vector<1x128xf32> to vector<16x128xf32>
    %188 = arith.subf %187, %153 : vector<16x128xf32>
    %189 = math.absf %188 : vector<16x128xf32>
    %cst_53 = arith.constant 1.000000e+00 : f32
    %190 = vector.broadcast %cst_53 : f32 to vector<16x128xf32>
    %191 = arith.subf %190, %189 : vector<16x128xf32>
    %cst_54 = arith.constant 0.000000e+00 : f32
    %192 = vector.broadcast %cst_54 : f32 to vector<16x128xf32>
    %193 = arith.maximumf %192, %191 : vector<16x128xf32>
    %194 = arith.mulf %193, %177 : vector<16x128xf32>
    %cst_55 = arith.constant dense<0.000000e+00> : vector<128xf32>
    %195 = vector.multi_reduction <add>, %194, %cst_55 [0] : vector<16x128xf32> to vector<128xf32>
    %196 = vector.shape_cast %195 : vector<128xf32> to vector<1x128xf32>
    %197 = arith.subf %186, %196 : vector<1x128xf32>
    %198 = arith.addf %176, %197 : vector<1x128xf32>
    %c32 = arith.constant 32 : index
    %c0_56 = arith.constant 0 : index
    %199 = vector.load %arg1[%c32, %c0_56] : memref<64x128xf32, #tpu.memory_space<vmem>>, vector<16x128xf32>
    %cst_57 = arith.constant dense<0xFF800000> : vector<128xf32>
    %200 = vector.multi_reduction <maximumf>, %199, %cst_57 [0] : vector<16x128xf32> to vector<128xf32>
    %201 = vector.shape_cast %200 : vector<128xf32> to vector<1x128xf32>
    %202 = vector.broadcast %201 : vector<1x128xf32> to vector<16x128xf32>
    %203 = arith.subf %199, %202 : vector<16x128xf32>
    %204 = math.exp %203 : vector<16x128xf32>
    %cst_58 = arith.constant dense<0.000000e+00> : vector<128xf32>
    %205 = vector.multi_reduction <add>, %204, %cst_58 [0] : vector<16x128xf32> to vector<128xf32>
    %206 = vector.shape_cast %205 : vector<128xf32> to vector<1x128xf32>
    %207 = math.log %206 : vector<1x128xf32>
    %208 = arith.addf %201, %207 : vector<1x128xf32>
    %209 = vector.broadcast %145 : vector<1x128xf32> to vector<16x128xf32>
    %210 = arith.subf %209, %153 : vector<16x128xf32>
    %211 = math.absf %210 : vector<16x128xf32>
    %cst_59 = arith.constant 1.000000e+00 : f32
    %212 = vector.broadcast %cst_59 : f32 to vector<16x128xf32>
    %213 = arith.subf %212, %211 : vector<16x128xf32>
    %cst_60 = arith.constant 0.000000e+00 : f32
    %214 = vector.broadcast %cst_60 : f32 to vector<16x128xf32>
    %215 = arith.maximumf %214, %213 : vector<16x128xf32>
    %216 = arith.mulf %215, %199 : vector<16x128xf32>
    %cst_61 = arith.constant dense<0.000000e+00> : vector<128xf32>
    %217 = vector.multi_reduction <add>, %216, %cst_61 [0] : vector<16x128xf32> to vector<128xf32>
    %218 = vector.shape_cast %217 : vector<128xf32> to vector<1x128xf32>
    %219 = arith.subf %208, %218 : vector<1x128xf32>
    %220 = arith.addf %198, %219 : vector<1x128xf32>
    %c48 = arith.constant 48 : index
    %c0_62 = arith.constant 0 : index
    %221 = vector.load %arg1[%c48, %c0_62] : memref<64x128xf32, #tpu.memory_space<vmem>>, vector<16x128xf32>
    %cst_63 = arith.constant dense<0xFF800000> : vector<128xf32>
    %222 = vector.multi_reduction <maximumf>, %221, %cst_63 [0] : vector<16x128xf32> to vector<128xf32>
    %223 = vector.shape_cast %222 : vector<128xf32> to vector<1x128xf32>
    %224 = vector.broadcast %223 : vector<1x128xf32> to vector<16x128xf32>
    %225 = arith.subf %221, %224 : vector<16x128xf32>
    %226 = math.exp %225 : vector<16x128xf32>
    %cst_64 = arith.constant dense<0.000000e+00> : vector<128xf32>
    %227 = vector.multi_reduction <add>, %226, %cst_64 [0] : vector<16x128xf32> to vector<128xf32>
    %228 = vector.shape_cast %227 : vector<128xf32> to vector<1x128xf32>
    %229 = math.log %228 : vector<1x128xf32>
    %230 = arith.addf %223, %229 : vector<1x128xf32>
    %231 = vector.broadcast %151 : vector<1x128xf32> to vector<16x128xf32>
    %232 = arith.subf %231, %153 : vector<16x128xf32>
    %233 = math.absf %232 : vector<16x128xf32>
    %cst_65 = arith.constant 1.000000e+00 : f32
    %234 = vector.broadcast %cst_65 : f32 to vector<16x128xf32>
    %235 = arith.subf %234, %233 : vector<16x128xf32>
    %cst_66 = arith.constant 0.000000e+00 : f32
    %236 = vector.broadcast %cst_66 : f32 to vector<16x128xf32>
    %237 = arith.maximumf %236, %235 : vector<16x128xf32>
    %238 = arith.mulf %237, %221 : vector<16x128xf32>
    %cst_67 = arith.constant dense<0.000000e+00> : vector<128xf32>
    %239 = vector.multi_reduction <add>, %238, %cst_67 [0] : vector<16x128xf32> to vector<128xf32>
    %240 = vector.shape_cast %239 : vector<128xf32> to vector<1x128xf32>
    %241 = arith.subf %230, %240 : vector<1x128xf32>
    %242 = arith.addf %220, %241 : vector<1x128xf32>
    %cst_68 = arith.constant 2.500000e-01 : f32
    %243 = vector.broadcast %cst_68 : f32 to vector<1x128xf32>
    %244 = arith.mulf %242, %243 : vector<1x128xf32>
    %c0_69 = arith.constant 0 : index
    %c0_70 = arith.constant 0 : index
    %245 = vector.load %arg3[%c0_69, %c0_70] : memref<1x128xf32, #tpu.memory_space<vmem>>, vector<1x128xf32>
    %246 = arith.mulf %123, %21 : vector<1x128xf32>
    %cst_71 = arith.constant 0.000000e+00 : f32
    %247 = vector.broadcast %cst_71 : f32 to vector<1x128xf32>
    %248 = arith.select %8, %246, %247 : vector<1x128xi1>, vector<1x128xf32>
    %249 = arith.addf %245, %248 : vector<1x128xf32>
    %c0_72 = arith.constant 0 : index
    %c0_73 = arith.constant 0 : index
    %250 = vector.load %arg3[%c0_72, %c0_73] : memref<1x128xf32, #tpu.memory_space<vmem>>, vector<1x128xf32>
    tpu.vector_store %arg3[%c0_72, %c0_73], %249 {strides = array<i32>} : memref<1x128xf32, #tpu.memory_space<vmem>>, vector<1x128xf32>,
    %c0_74 = arith.constant 0 : index
    %c0_75 = arith.constant 0 : index
    %251 = vector.load %arg4[%c0_74, %c0_75] : memref<1x128xf32, #tpu.memory_space<vmem>>, vector<1x128xf32>
    %252 = arith.mulf %244, %21 : vector<1x128xf32>
    %cst_76 = arith.constant 0.000000e+00 : f32
    %253 = vector.broadcast %cst_76 : f32 to vector<1x128xf32>
    %254 = arith.select %8, %252, %253 : vector<1x128xi1>, vector<1x128xf32>
    %255 = arith.addf %251, %254 : vector<1x128xf32>
    %c0_77 = arith.constant 0 : index
    %c0_78 = arith.constant 0 : index
    %256 = vector.load %arg4[%c0_77, %c0_78] : memref<1x128xf32, #tpu.memory_space<vmem>>, vector<1x128xf32>
    tpu.vector_store %arg4[%c0_77, %c0_78], %255 {strides = array<i32>} : memref<1x128xf32, #tpu.memory_space<vmem>>, vector<1x128xf32>,
    return
  }
  func.func @transform_0(%arg0: i32) -> (i32, i32) {
    %c0_i32 = arith.constant 0 : i32
    %c0_i32_0 = arith.constant 0 : i32
    return %c0_i32, %arg0 : i32, i32
  }
  func.func @transform_1(%arg0: i32) -> (i32, i32) {
    %c0_i32 = arith.constant 0 : i32
    %c0_i32_0 = arith.constant 0 : i32
    return %c0_i32, %arg0 : i32, i32
  }
  func.func @transform_2(%arg0: i32) -> (i32, i32) {
    %c0_i32 = arith.constant 0 : i32
    %c0_i32_0 = arith.constant 0 : i32
    %c0_i32_1 = arith.constant 0 : i32
    return %c0_i32, %c0_i32_0 : i32, i32
  }
  func.func @transform_3(%arg0: i32) -> (i32, i32) {
    %c0_i32 = arith.constant 0 : i32
    %c0_i32_0 = arith.constant 0 : i32
    %c0_i32_1 = arith.constant 0 : i32
    return %c0_i32, %c0_i32_0 : i32, i32
  }
}

</mosaic_0001>

<bundles_post_ra>
// kernel: rotated_bbox_loss.1
= control target key start
LH: loop header
LB: loop body
LE: loop exit
PB: predicated region body
PF: predicated region fallthrough
CT: control target
= control target key end

     0   :  { %v853_v0 = vmov 0.0   ;;  %v854_v24 = vmov 683565275   ;;  %v855_v26 = vmov 2475754826   ;;  %s1281_s1 = inlined_call_operand.vmem [shape: f32[13,128], index: 1, kind: input, shape index: {}]   ;;  %s1282_s2 = inlined_call_operand.vmem [shape: f32[1,128], index: 2, kind: output, shape index: {0}]   ;;  %s1283_s3 = inlined_call_operand.vmem [shape: f32[1,128], index: 3, kind: output, shape index: {1}]   ;;  %s1284_s0 = inlined_call_operand.vmem [shape: f32[64,128], index: 0, kind: input, shape index: {}]  }
   0x1   :  { %17 = vst [vmem:[%s1282_s2] sm:$0x1] %v853_v0  ;;  %18 = vst [vmem:[%s1283_s3] sm:$0x1] %v853_v0  ;;  %v889_v1 = vld [vmem:[%s1281_s1 + $0x4] sm:$0x1]  ;;  %v896_v4 = vld [vmem:[%s1281_s1 + $0x9] sm:$0x1] }
   0x2   :  { %v42_v2 = vand.u32 2147483647, %v889_v1  ;;  %v45_v3 = vand.u32 2139095040, %v889_v1  ;;  %v267_v8 = vand.u32 2139095040, %v896_v4  ;;  %v264_v9 = vand.u32 2147483647, %v896_v4 }
   0x3   :  { %v905_v14 = vld [vmem:[%s1284_s0] sm:$0xff]  ;;  %v910_v15 = vld [vmem:[%s1284_s0 + $0x8] sm:$0xff]  ;;  %v856_v28 = vmov 2131351028   ;;  %v857_v30 = vmov 2102212464  }
   0x4   :  { %v46_v5 = vshrl.u32 %v45_v3, 23  ;;  %v49_v6 = vand.u32 8388607, %v42_v2  ;;  %v268_v11 = vshrl.u32 %v267_v8, 23  ;;  %v271_v17 = vand.u32 8388607, %v264_v9 }
   0x5   :  { %v918_v22 = vmax.f32 %v905_v14, %v910_v15  ;;  %v858_v32 = vmov 920167782   ;;  %v859_v40 = vmov 1326507024   ;;  %vm44_vm12 = vcmp.lt.s32.totalorder %v889_v1, 0 }
   0x6   :  { %v778_v7 = vadd.s32 4294967169, %v46_v5  ;;  %v50_v12 = vor.u32 8388608, %v49_v6  ;;  %v786_v13 = vadd.s32 4294967169, %v268_v11  ;;  %v272_v34 = vor.u32 8388608, %v271_v17 }
   0x7   :  { %v570_v55 = vrot.slane %v918_v22, 4  ;;  %vm1057_vm14 = vcmp.le.f32.partialorder %v42_v2, 0.7853982  ;;  %v1075_v2 = vld [vmem:[%s1281_s1 + $0xb] sm:$0x1]  ;;  %vm266_vm15 = vcmp.lt.s32.totalorder %v896_v4, 0 }
   0x8   :  { %v52_v10 = vadd.s32 1, %v778_v7  ;;  %v914_v20 = vshll.u32 %v50_v12, 8  ;;  %v274_v21 = vadd.s32 1, %v786_v13  ;;  %v927_v63 = vshll.u32 %v272_v34, 8 }
   0xa   :  { %vm53_vm0 = vcmp.gt.s32.totalorder %v52_v10, 0  ;;  %vm275_vm4 = vcmp.gt.s32.totalorder %v274_v21, 0 }
   0xb   :  { %v54_v16 = vsel %vm53_vm0, %v52_v10, 0  ;;  %v276_v47 = vsel %vm275_vm4, %v274_v21, 0 }
   0xc   :  { %v55_v18 = vshrl.u32 %v54_v16, 5  ;;  %v56_v19 = vand.u32 31, %v54_v16  ;;  %v277_v58 = vshrl.u32 %v276_v47, 5  ;;  %v278_v59 = vand.u32 31, %v276_v47 }
   0xe   :  { %v57_v23 = vsub.s32 32, %v56_v19  ;;  %v59_v25 = vshll.u32 %v854_v24, %v56_v19  ;;  %v62_v27 = vshll.u32 %v855_v26, %v56_v19  ;;  %v65_v29 = vshll.u32 %v856_v28, %v56_v19 }
   0xf   :  { %v68_v31 = vshll.u32 %v857_v30, %v56_v19  ;;  %v71_v33 = vshll.u32 %v858_v32, %v56_v19  ;;  %vm74_vm1 = vcmp.lt.s32.totalorder %v55_v18, 1  ;;  %vm75_vm2 = vcmp.lt.s32.totalorder %v55_v18, 2 }
  0x10   :  { %v58_v35 = vshrl.u32 %v854_v24, %v57_v23  ;;  %v60_v36 = vshrl.u32 %v855_v26, %v57_v23  ;;  %v63_v37 = vshrl.u32 %v856_v28, %v57_v23  ;;  %v66_v38 = vshrl.u32 %v857_v30, %v57_v23 }
  0x11   :  { %v69_v39 = vshrl.u32 %v858_v32, %v57_v23  ;;  %v72_v41 = vshrl.u32 %v859_v40, %v57_v23  ;;  %vm77_vm3 = vcmp.lt.s32.totalorder %v55_v18, 4  ;;  %vm76_vm5 = vcmp.lt.s32.totalorder %v55_v18, 3 }
  0x12   :  { %v61_v42 = vor.u32 %v60_v36, %v59_v25  ;;  %v64_v43 = vor.u32 %v63_v37, %v62_v27  ;;  %v67_v44 = vor.u32 %v66_v38, %v65_v29  ;;  %v279_v7 = vsub.s32 32, %v278_v59 }
  0x13   :  { %v70_v45 = vor.u32 %v69_v39, %v68_v31  ;;  %v73_v46 = vor.u32 %v72_v41, %v71_v33  ;;  %v281_v8 = vshll.u32 %v854_v24, %v278_v59  ;;  %v284_v10 = vshll.u32 %v855_v26, %v278_v59 }
  0x14   :  { %v78_v48 = vsel %vm74_vm1, %v58_v35, %v61_v42  ;;  %v79_v49 = vsel %vm77_vm3, %v67_v44, 2102212464  ;;  %v82_v50 = vsel %vm74_vm1, %v61_v42, %v64_v43  ;;  %v86_v51 = vsel %vm74_vm1, %v64_v43, %v67_v44 }
  0x15   :  { %v80_v52 = vsel %vm76_vm5, %v64_v43, %v79_v49  ;;  %v83_v53 = vsel %vm77_vm3, %v70_v45, 920167782  ;;  %v87_v54 = vsel %vm77_vm3, %v73_v46, 1326507024  ;;  %v287_v11 = vshll.u32 %v856_v28, %v278_v59 }
  0x16   :  { %v84_v56 = vsel %vm76_vm5, %v67_v44, %v83_v53  ;;  %v88_v57 = vsel %vm76_vm5, %v70_v45, %v87_v54  ;;  %v81_v60 = vsel %vm75_vm2, %v78_v48, %v80_v52  ;;  %v290_v13 = vshll.u32 %v857_v30, %v278_v59 }
  0x17   :  { %v85_v61 = vsel %vm75_vm2, %v82_v50, %v84_v56  ;;  %v89_v62 = vsel %vm75_vm2, %v86_v51, %v88_v57  ;;  %v97_v12 = vmul.u32 %v914_v20, %v81_v60  ;;  %v293_v16 = vshll.u32 %v858_v32, %v278_v59  ;;  %v27_v56 = vld [vmem:[%s1281_s1 + $0x2] sm:$0x1]  ;;  %v979_v59 = vld [vmem:[%s1284_s0 + $0x10] sm:$0xff]  ;;  %v984_v60 = vld [vmem:[%s1284_s0 + $0x18] sm:$0xff] }
  0x18   :  { %v930_v0 = vmul.u32.u64.low %v914_v20, %v89_v62  ;;  %v931_v3 = vmul.u32.u64.high %v914_v20, %v89_v62, %v930_v0  ;;  %v934_v5 = vmul.u32.u64.low %v914_v20, %v85_v61  ;;  %v935_v6 = vmul.u32.u64.high %v914_v20, %v85_v61, %v934_v5  ;;  %v32_v61 = vld [vmem:[%s1281_s1 + $0x7] sm:$0x1]  ;;  %v33_v62 = vld [vmem:[%s1281_s1 + $0x8] sm:$0x1] }
  0x19   :  { %vm296_vm6 = vcmp.lt.s32.totalorder %v277_v58, 1  ;;  %v280_v17 = vshrl.u32 %v854_v24, %v279_v7  ;;  %v282_v18 = vshrl.u32 %v855_v26, %v279_v7  ;;  %v285_v19 = vshrl.u32 %v856_v28, %v279_v7 }
  0x1a   :  { %v288_v21 = vshrl.u32 %v857_v30, %v279_v7  ;;  %vm99_vm7 = vc.u32 %v931_v3, %v934_v5  ;;  %v100_v23 = vadd.s32 1, %v935_v6  ;;  %v291_v25 = vshrl.u32 %v858_v32, %v279_v7 }
  0x1b   :  { %vm297_vm8 = vcmp.lt.s32.totalorder %v277_v58, 2  ;;  %v283_v27 = vor.u32 %v282_v18, %v281_v8  ;;  %v286_v29 = vor.u32 %v285_v19, %v284_v10  ;;  %v294_v33 = vshrl.u32 %v859_v40, %v279_v7  ;;  %v996_v7 = vld [vmem:[%s1284_s0 + $0x20] sm:$0xff]  ;;  %v1001_v8 = vld [vmem:[%s1284_s0 + $0x28] sm:$0xff] }
  0x1c   :  { %v289_v31 = vor.u32 %v288_v21, %v287_v11  ;;  %v101_v20 = vsel %vm99_vm7, %v100_v23, %v935_v6  ;;  %v292_v34 = vor.u32 %v291_v25, %v290_v13  ;;  %vm298_vm9 = vcmp.lt.s32.totalorder %v277_v58, 3 }
  0x1d   :  { %vm299_vm10 = vcmp.lt.s32.totalorder %v277_v58, 4  ;;  %v102_v24 = vadd.s32 %v101_v20, %v97_v12  ;;  %v295_v26 = vor.u32 %v294_v33, %v293_v16  ;;  %v300_v28 = vsel %vm296_vm6, %v280_v17, %v283_v27 }
  0x1e   :  { %v301_v30 = vsel %vm299_vm10, %v289_v31, 2102212464  ;;  %v304_v36 = vsel %vm296_vm6, %v283_v27, %v286_v29  ;;  %v305_v37 = vsel %vm299_vm10, %v292_v34, 920167782  ;;  %v308_v32 = vsel %vm296_vm6, %v286_v29, %v289_v31 }
  0x1f   :  { %v302_v35 = vsel %vm298_vm9, %v286_v29, %v301_v30  ;;  %v103_v38 = vadd.s32 536870912, %v102_v24  ;;  %v306_v39 = vsel %vm298_vm9, %v289_v31, %v305_v37  ;;  %v309_v41 = vsel %vm299_vm10, %v295_v26, 1326507024  ;;  %v1014_v29 = vld [vmem:[%s1281_s1 + $0x5] sm:$0x1] }
  0x20   :  { %v303_v40 = vsel %vm297_vm8, %v300_v28, %v302_v35  ;;  %v307_v42 = vsel %vm297_vm8, %v304_v36, %v306_v39  ;;  %v310_v43 = vsel %vm298_vm9, %v292_v34, %v309_v41  ;;  %v571_v50 = vmax.f32 %v918_v22, %v570_v55  ;;  %v28_v22 = vld [vmem:[%s1281_s1 + $0x3] sm:$0x1] }
  0x21   :  { %v948_v44 = vshrl.u32 %v103_v38, 30  ;;  %v311_v45 = vsel %vm297_vm8, %v308_v32, %v310_v43  ;;  %v952_v46 = vmul.u32.u64.low %v927_v63, %v307_v42  ;;  %v953_v47 = vmul.u32.u64.high %v927_v63, %v307_v42, %v952_v46  ;;  %v1031_v32 = vld [vmem:[%s1284_s0 + $0x30] sm:$0xff]  ;;  %v1036_v38 = vld [vmem:[%s1284_s0 + $0x38] sm:$0xff] }
  0x22   :  { %v957_v48 = vmul.u32.u64.low %v927_v63, %v311_v45  ;;  %v958_v49 = vmul.u32.u64.high %v927_v63, %v311_v45, %v957_v48  ;;  %v319_v52 = vmul.u32 %v927_v63, %v303_v40  ;;  %v572_v57 = vrot.slane %v571_v50, 2  ;;  %v1043_v40 = vld [vmem:[%s1281_s1 + $0xa] sm:$0x1] }
  0x23   :  { %v105_v51 = vshll.u32 %v948_v44, 30  ;;  %v322_v54 = vadd.s32 1, %v953_v47  ;;  %v38_v0 = vmul.f32 %v27_v56, %v27_v56  ;;  %v40_v10 = vmul.f32 %v28_v22, %v28_v22  ;;  %v1053_v48 = vld [vmem:[%s1281_s1 + $0x6] sm:$0x1] }
  0x24   :  { %vm321_vm11 = vc.u32 %v958_v49, %v952_v46  ;;  %v573_v12 = vmax.f32 %v571_v50, %v572_v57  ;;  %v617_v13 = vmax.f32 %v979_v59, %v984_v60  ;;  %v260_v17 = vmul.f32 %v32_v61, %v32_v61 }
  0x25   :  { %v963_v53 = vsub.s32 %v102_v24, %v105_v51  ;;  %v323_v58 = vsel %vm321_vm11, %v322_v54, %v953_v47  ;;  %v262_v18 = vmul.f32 %v33_v62, %v33_v62  ;;  %v665_v21 = vmax.f32 %v996_v7, %v1001_v8 }
  0x26   :  { %v324_v63 = vadd.s32 %v323_v58, %v319_v52  ;;  %v1009_v23 = vmul.f32 0.083333336, %v38_v0  ;;  %v544_v27 = vmul.f32 0.5, %v32_v61  ;;  %v1016_v31 = vmul.f32 0.083333336, %v40_v10 }
  0x27   :  { %v108_v55 = vsub.s32 0, %v963_v53  ;;  %v574_v20 = vrot.slane %v573_v12, 1  ;;  %v618_v34 = vrot.slane %v617_v13, 4  ;;  %v98_v24 = vadd.s32 %v934_v5, %v931_v3 }
  0x28   :  { %v325_v11 = vadd.s32 536870912, %v324_v63  ;;  %v1022_v26 = vmul.f32 0.083333336, %v260_v17  ;;  %v1024_v28 = vmul.f32 0.083333336, %v262_v18  ;;  %v545_v36 = vmul.f32 0.5, %v33_v62 }
  0x29   :  { %v779_v6 = vmin.u32 %v108_v55, %v963_v53  ;;  %v666_v37 = vrot.slane %v665_v21, 4  ;;  %v546_v41 = vsub.f32 %v1014_v29, %v544_v27  ;;  %v257_v42 = vsub.f32 %v1009_v23, %v1016_v31 }
  0x2a   :  { %v1005_v19 = vshrl.u32 %v325_v11, 30  ;;  %v1048_v45 = vmax.f32 %v573_v12, %v574_v20  ;;  %v619_v47 = vmax.f32 %v617_v13, %v618_v34  ;;  %v1065_v54 = vmax.f32 %v1031_v32, %v1036_v38 }
  0x2b   :  { %v110_v16 = vclz %v779_v6  ;;  %v128_v56 = vsub.s32 4, %v948_v44  ;;  %v550_v22 = vsub.f32 %v1053_v48, %v545_v36  ;;  %v1070_v55 = vmax.f32 %v665_v21, %v666_v37 }
  0x2c   :  { %v327_v33 = vshll.u32 %v1005_v19, 30  ;;  %v547_v62 = vsub.f32 %v1043_v40, %v546_v41  ;;  %v562_v6 = vlaneseq  ;;  %v576_v10 = vsub.f32 %v905_v14, %v1048_v45 }
  0x2d   :  { %v780_v25 = vadd.s32 4294967294, %v110_v16  ;;  %v620_v11 = vrot.slane %v619_v47, 2  ;;  %v577_v16 = vsub.f32 %v910_v15, %v1048_v45  ;;  %v714_v17 = vrot.slane %v1065_v54, 4 }
  0x2e   :  { %v1026_v35 = vsub.s32 %v324_v63, %v327_v33  ;;  %v554_v63 = vadd.f32 %v544_v27, %v1014_v29  ;;  %v129_v18 = vsel %vm44_vm12, %v128_v56, %v948_v44  ;;  %v1089_v27 = vadd.f32 %v545_v36, %v1053_v48 }
  0x2f   :  { %vm781_vm13 = vcmp.lt.s32.totalorder %v780_v25, 0  ;;  %v548_v20 = vmax.f32 %v547_v62, 0.0  ;;  %v563_v37 = vshrl.u32 %v562_v6, 7  ;;  %v131_v36 = vsel %vm1057_vm14, 0, %v129_v18 }
  0x30   :  { %v113_v30 = vsel %vm781_vm13, 0, %v780_v25  ;;  %v330_v43 = vsub.s32 0, %v1026_v35  ;;  %v551_v25 = vsub.f32 %v1075_v2, %v550_v22  ;;  %v555_v34 = vsub.f32 %v554_v63, %v1043_v40 }
  0x31   :  { %v114_v3 = vsub.s32 32, %v113_v30  ;;  %v115_v5 = vshll.u32 %v963_v53, %v113_v30  ;;  %v118_v39 = vsub.s32 4294967266, %v113_v30  ;;  %v479_v53 = vsub.f32 %v1022_v26, %v1024_v28 }
  0x32   :  { %v787_v57 = vmin.u32 %v330_v43, %v1026_v35  ;;  %v320_v30 = vadd.s32 %v952_v46, %v958_v49  ;;  %v549_v56 = vmin.f32 %v548_v20, 14.99  ;;  %vm1104_vm1 = vcmp.le.f32.partialorder %v264_v9, 0.7853982 }
  0x33   :  { %v116_v51 = vshrl.u32 %v98_v24, %v114_v3  ;;  %v119_v52 = vadd.s32 127, %v118_v39  ;;  %v621_v24 = vmax.f32 %v619_v47, %v620_v11  ;;  %v578_v3 = vmul.f32 1.442695, %v576_v10 }
  0x34   :  { %v332_v0 = vclz %v787_v57  ;;  %v580_v39 = vmul.f32 1.442695, %v577_v16  ;;  %v668_v62 = vrot.slane %v1070_v55, 2  ;;  %v238_v10 = vadd.s32 3, %v131_v36 }
  0x35   :  { %v117_v58 = vor.u32 %v116_v51, %v115_v5  ;;  %v120_v61 = vshll.u32 %v119_v52, 23  ;;  %v622_v41 = vrot.slane %v621_v24, 1  ;;  %v1098_v52 = vand.u32 3, %v131_v36 }
  0x36   :  { %v788_v21 = vadd.s32 4294967294, %v332_v0  ;;  %809 = vpow2.f32 %v578_v3  ;;  %v564_v11 = vadd.s32 8, %v563_v37  ;;  %v552_v18 = vmax.f32 %v551_v25, 0.0 }
  0x37   :  { %v121_v12 = vor.u32 4788187, %v120_v61  ;;  %v124_v13 = vcvt.s32.f32 %v117_v58  ;;  %v1100_v57 = vmax.f32 %v621_v24, %v622_v41  ;;  %v350_v58 = vsub.s32 4, %v1005_v19 }
  0x38   :  { %vm789_vm0 = vcmp.lt.s32.totalorder %v788_v21, 0  ;;  %811 = vpow2.f32 %v580_v39  ;;  %v1111_v61 = vsub.s32 0, %v563_v37  ;;  %v1128_v20 = vcvt.s32.f32 %v563_v37 }
  0x39   :  { %v122_v33 = vand.u32 2147483647, %v121_v12  ;;  %v335_v5 = vsel %vm789_vm0, 0, %v788_v21  ;;  %v624_v6 = vsub.f32 %v979_v59, %v1100_v57  ;;  %v625_v12 = vsub.f32 %v984_v60, %v1100_v57 }
  0x3a   :  { %v336_v43 = vsub.s32 32, %v335_v5  ;;  %v337_v51 = vshll.u32 %v1026_v35, %v335_v5  ;;  %v340_v40 = vsub.s32 4294967266, %v335_v5  ;;  %v351_v50 = vsel %vm266_vm15, %v350_v58, %v1005_v19 }
  0x3b   :  { %v125_v44 = vmul.f32 %v124_v13, %v122_v33  ;;  %v1124_v21 = vmax.f32 %v555_v34, 0.0  ;;  %v559_v33 = vsub.f32 %v1089_v27, %v1075_v2  ;;  %v626_v3 = vmul.f32 1.442695, %v624_v6 }
  0x3c   :  { %v338_v49 = vshrl.u32 %v320_v30, %v336_v43  ;;  %v341_v22 = vadd.s32 127, %v340_v40  ;;  %v595_v30 = vrot.slane %v549_v56, %v1111_v61  ;;  %vm136_vm2 = vcmp.lt.s32.totalorder %v1098_v52, 2 }
  0x3d   :  { %v126_v47 = vxor.u32 2147483648, %v125_v44  ;;  %v239_v25 = vand.u32 3, %v238_v10  ;;  %v1133_v5 = vcvt.s32.f32 %v564_v11  ;;  %v628_v39 = vmul.f32 1.442695, %v625_v12 }
  0x3e   :  { %v339_v63 = vor.u32 %v338_v49, %v337_v51  ;;  %v342_v0 = vshll.u32 %v341_v22, 23  ;;  %vm134_vm3 = vweird.f32 %v889_v1  ;;  %vm137_vm4 = vcmp.eq.s32.totalorder %v1098_v52, 0 }
  0x3f   :  { %v127_v35 = vsel %vm44_vm12, %v126_v47, %v125_v44  ;;  %v669_v44 = vmax.f32 %v1070_v55, %v668_v62  ;;  %vm140_vm5 = vcmp.eq.s32.totalorder %v1098_v52, 2  ;;  %v353_v27 = vsel %vm1104_vm1, 0, %v351_v50 }
  0x40   :  { %v130_v9 = vsel %vm1057_vm14, %v889_v1, %v127_v35  ;;  %v343_v13 = vor.u32 4788187, %v342_v0  ;;  %v346_v16 = vcvt.s32.f32 %v339_v63  ;;  %v553_v34 = vmin.f32 %v552_v18, 14.99  ;;  %v810_v41 = vpop.eup %809 }
  0x41   :  { %813 = vcosq.f32 %v130_v9  ;;  %v670_v2 = vrot.slane %v669_v44, 1  ;;  %v557_v55 = vmin.f32 %v1124_v21, 14.99  ;;  %v1141_v37 = vmax.f32 %v559_v33, 0.0 }
  0x42   :  { %815 = vsinq.f32 %v130_v9  ;;  %v344_v24 = vand.u32 2147483647, %v343_v13  ;;  %v596_v43 = vsub.f32 %v595_v30, %v1128_v20  ;;  %v812_v40 = vpop.eup %811  ;;  %vm240_vm6 = vcmp.lt.s32.totalorder %v239_v25, 2 }
  0x43   :  { %817 = vpow2.f32 %v626_v3  ;;  %v1144_v51 = vmax.f32 %v669_v44, %v670_v2  ;;  %vm241_vm7 = vcmp.eq.s32.totalorder %v239_v25, 0  ;;  %v597_v47 = vsub.f32 %v595_v30, %v1133_v5 }
  0x44   :  { %v347_v19 = vmul.f32 %v346_v16, %v344_v24  ;;  %819 = vpow2.f32 %v628_v39  ;;  %v460_v49 = vadd.s32 3, %v353_v27  ;;  %vm244_vm8 = vcmp.eq.s32.totalorder %v239_v25, 2 }
  0x45   :  { %v672_v22 = vsub.f32 %v996_v7, %v1144_v51  ;;  %v673_v58 = vsub.f32 %v1001_v8, %v1144_v51  ;;  %v1156_v9 = vand.u32 3, %v353_v27  ;;  %v643_v63 = vrot.slane %v553_v34, %v1111_v61 }
  0x46   :  { %v348_v36 = vxor.u32 2147483648, %v347_v19  ;;  %v561_v10 = vmin.f32 %v1141_v37, 14.99  ;;  %v598_v11 = vand.u32 2147483647, %v596_v43  ;;  %v461_v46 = vand.u32 3, %v460_v49 }
  0x47   :  { %v599_v13 = vand.u32 2147483647, %v597_v47  ;;  %v674_v16 = vmul.f32 1.442695, %v672_v22  ;;  %v676_v21 = vmul.f32 1.442695, %v673_v58  ;;  %v582_v30 = vadd.f32 %v812_v40, %v810_v41 }
  0x48   :  { %v349_v56 = vsel %vm266_vm15, %v348_v36, %v347_v19  ;;  %vm359_vm9 = vcmp.eq.s32.totalorder %v1156_v9, 0  ;;  %v644_v3 = vsub.f32 %v643_v63, %v1128_v20  ;;  %vm358_vm10 = vcmp.lt.s32.totalorder %v1156_v9, 2 }
  0x49   :  { %v352_v62 = vsel %vm1104_vm1, %v896_v4, %v349_v56  ;;  %vm362_vm11 = vcmp.eq.s32.totalorder %v1156_v9, 2  ;;  %v600_v19 = vsub.f32 1.0, %v598_v11  ;;  %vm356_vm12 = vweird.f32 %v896_v4 }
  0x4a   :  { %821 = vcosq.f32 %v352_v62  ;;  %v601_v34 = vsub.f32 1.0, %v599_v13  ;;  %v715_v25 = vmax.f32 %v1065_v54, %v714_v17  ;;  %vm462_vm13 = vcmp.lt.s32.totalorder %v461_v46, 2 }
  0x4b   :  { %v814_v35 = vpop.eup %813  ;;  %823 = vsinq.f32 %v352_v62  ;;  %v583_v40 = vrot.slane %v582_v30, 4  ;;  %v645_v47 = vsub.f32 %v643_v63, %v1133_v5  ;;  %v646_v56 = vand.u32 2147483647, %v644_v3 }
  0x4c   :  { %v816_v0 = vpop.eup %815  ;;  %v141_v6 = vxor.u32 2147483648, %v814_v35  ;;  %825 = vpow2.f32 %v674_v16  ;;  %vm463_vm14 = vcmp.eq.s32.totalorder %v461_v46, 0  ;;  %vm466_vm15 = vcmp.eq.s32.totalorder %v461_v46, 2 }
  0x4d   :  { %v138_v12 = vxor.u32 2147483648, %v816_v0  ;;  %v818_v41 = vpop.eup %817  ;;  %827 = vpow2.f32 %v676_v21  ;;  %v691_v49 = vrot.slane %v557_v55, %v1111_v61  ;;  %v602_v62 = vmax.f32 %v600_v19, 0.0 }
  0x4e   :  { %v142_v18 = vsel %vm140_vm5, %v141_v6, %v816_v0  ;;  %v246_v50 = vsel %vm244_vm8, %v141_v6, %v816_v0  ;;  %v820_v43 = vpop.eup %819  ;;  %v603_v63 = vmax.f32 %v601_v34, 0.0  ;;  %v716_v6 = vrot.slane %v715_v25, 2 }
  0x4f   :  { %v139_v33 = vsel %vm137_vm4, %v814_v35, %v138_v12  ;;  %v243_v24 = vsel %vm241_vm7, %v814_v35, %v138_v12  ;;  %v630_v0 = vadd.f32 %v820_v43, %v818_v41  ;;  %v647_v13 = vand.u32 2147483647, %v645_v47 }
  0x50   :  { %v143_v44 = vsel %vm136_vm2, %v139_v33, %v142_v18  ;;  %v247_v39 = vsel %vm240_vm6, %v243_v24, %v246_v50  ;;  %v648_v16 = vsub.f32 1.0, %v646_v56  ;;  %v692_v50 = vsub.f32 %v691_v49, %v1128_v20 }
  0x51   :  { %v144_v2 = vsel %vm134_vm3, nan, %v143_v44  ;;  %v248_v27 = vsel %vm134_vm3, nan, %v247_v39  ;;  %v693_v21 = vsub.f32 %v691_v49, %v1133_v5  ;;  %v631_v44 = vrot.slane %v630_v0, 4 }
  0x52   :  { %v249_v52 = vmul.f32 %v144_v2, %v144_v2  ;;  %v250_v36 = vmul.f32 %v248_v27, %v248_v27  ;;  %v258_v1 = vmul.f32 %v257_v42, %v144_v2  ;;  %v584_v42 = vadd.f32 %v583_v40, %v582_v30 }
  0x53   :  { %v717_v39 = vmax.f32 %v715_v25, %v716_v6  ;;  %v649_v34 = vsub.f32 1.0, %v647_v13  ;;  %v650_v41 = vmax.f32 %v648_v16, 0.0  ;;  %v694_v47 = vand.u32 2147483647, %v692_v50 }
  0x54   :  { %v251_v22 = vmul.f32 %v249_v52, %v1009_v23  ;;  %v252_v58 = vmul.f32 %v250_v36, %v1016_v31  ;;  %v254_v54 = vmul.f32 %v250_v36, %v1009_v23  ;;  %v255_v17 = vmul.f32 %v249_v52, %v1016_v31  ;;  %v822_v35 = vpop.eup %821 }
  0x55   :  { %v824_v11 = vpop.eup %823  ;;  %v363_v12 = vxor.u32 2147483648, %v822_v35  ;;  %v1189_v18 = vmul.f32 %v258_v1, %v248_v27  ;;  %v632_v1 = vadd.f32 %v631_v44, %v630_v0  ;;  %v605_v37 = vmul.f32 %v603_v63, %v910_v15 }
  0x56   :  { %v360_v55 = vxor.u32 2147483648, %v824_v11  ;;  %v1193_v23 = vadd.f32 %v252_v58, %v251_v22  ;;  %v1195_v31 = vadd.f32 %v255_v17, %v254_v54  ;;  %v826_v19 = vpop.eup %825  ;;  %v695_v22 = vand.u32 2147483647, %v693_v21 }
  0x57   :  { %v364_v33 = vsel %vm362_vm11, %v363_v12, %v824_v11  ;;  %v468_v24 = vsel %vm466_vm15, %v363_v12, %v824_v11  ;;  %v828_v52 = vpop.eup %827  ;;  %v505_v40 = vmul.f32 %v1189_v18, %v1189_v18  ;;  %v718_v58 = vrot.slane %v717_v39, 1 }
  0x58   :  { %v361_v30 = vsel %vm359_vm9, %v822_v35, %v360_v55  ;;  %v465_v3 = vsel %vm463_vm14, %v822_v35, %v360_v55  ;;  %v504_v46 = vmul.f32 %v1195_v31, %v1193_v23  ;;  %v678_v49 = vadd.f32 %v828_v52, %v826_v19 }
  0x59   :  { %v365_v2 = vsel %vm358_vm10, %v361_v30, %v364_v33  ;;  %v469_v27 = vsel %vm462_vm13, %v465_v3, %v468_v24  ;;  %v1223_v12 = vmax.f32 %v717_v39, %v718_v58  ;;  %v585_v55 = vrot.slane %v584_v42, 2 }
  0x5a   :  { %v366_v36 = vsel %vm356_vm12, nan, %v365_v2  ;;  %v470_v43 = vsel %vm356_vm12, nan, %v469_v27  ;;  %v679_v11 = vrot.slane %v678_v49, 4  ;;  %v506_v16 = vsub.f32 %v504_v46, %v505_v40 }
  0x5b   :  { %v471_v25 = vmul.f32 %v366_v36, %v366_v36  ;;  %v472_v56 = vmul.f32 %v470_v43, %v470_v43  ;;  %v480_v9 = vmul.f32 %v479_v53, %v366_v36  ;;  %v739_v53 = vrot.slane %v561_v10, %v1111_v61 }
  0x5c   :  { %v651_v21 = vmax.f32 %v649_v34, 0.0  ;;  %v680_v24 = vadd.f32 %v679_v11, %v678_v49  ;;  %v720_v30 = vsub.f32 %v1031_v32, %v1223_v12  ;;  %v604_v3 = vmul.f32 %v602_v62, %v905_v14 }
  0x5d   :  { %v473_v4 = vmul.f32 %v471_v25, %v1022_v26  ;;  %v474_v54 = vmul.f32 %v472_v56, %v1024_v28  ;;  %v476_v17 = vmul.f32 %v472_v56, %v1022_v26  ;;  %v477_v35 = vmul.f32 %v471_v25, %v1024_v28 }
  0x5e   :  { %v1221_v6 = vmul.f32 %v480_v9, %v470_v43  ;;  %v696_v26 = vsub.f32 1.0, %v694_v47  ;;  %v633_v28 = vrot.slane %v632_v1, 2  ;;  %v697_v61 = vsub.f32 1.0, %v695_v22 }
  0x5f   :  { %v475_v0 = vadd.f32 %v474_v54, %v473_v4  ;;  %v478_v13 = vadd.f32 %v477_v35, %v476_v17  ;;  %v740_v10 = vsub.f32 %v739_v53, %v1128_v20  ;;  %v507_v44 = vmax.f32 %v506_v16, 0.0 }
  0x60   :  { %v509_v50 = vmul.f32 %v1221_v6, %v1221_v6  ;;  %v586_v19 = vadd.f32 %v585_v55, %v584_v42  ;;  %v652_v2 = vmul.f32 %v650_v41, %v979_v59  ;;  %v653_v27 = vmul.f32 %v651_v21, %v984_v60 }
  0x61   :  { %v508_v33 = vmul.f32 %v478_v13, %v475_v0  ;;  %v721_v34 = vsub.f32 %v1036_v38, %v1223_v12  ;;  %v722_v52 = vmul.f32 1.442695, %v720_v30  ;;  %v741_v36 = vsub.f32 %v739_v53, %v1133_v5 }
  0x62   :  { %v634_v14 = vadd.f32 %v633_v28, %v632_v1  ;;  %v681_v62 = vrot.slane %v680_v24, 2  ;;  %v698_v15 = vmax.f32 %v696_v26, 0.0  ;;  %v699_v63 = vmax.f32 %v697_v61, 0.0 }
  0x63   :  { %v510_v39 = vsub.f32 %v508_v33, %v509_v50  ;;  %829 = vpow2.f32 %v722_v52  ;;  %v724_v20 = vmul.f32 1.442695, %v721_v34  ;;  %v742_v40 = vand.u32 2147483647, %v740_v10 }
  0x64   :  { %v587_v42 = vrot.slane %v586_v19, 1  ;;  %v606_v25 = vadd.f32 %v605_v37, %v604_v3  ;;  %v654_v59 = vadd.f32 %v653_v27, %v652_v2  ;;  %v743_v60 = vand.u32 2147483647, %v741_v36 }
  0x65   :  { %v511_v43 = vmax.f32 %v510_v39, 0.0  ;;  %831 = vpow2.f32 %v724_v20  ;;  %v744_v41 = vsub.f32 1.0, %v742_v40  ;;  %v635_v56 = vrot.slane %v634_v14, 1  ;;  %v26_v20 = vld [vmem:[%s1281_s1 + $0x1] sm:$0x1] }
  0x66   :  { %v682_v9 = vadd.f32 %v681_v62, %v680_v24  ;;  %v700_v5 = vmul.f32 %v698_v15, %v996_v7  ;;  %v701_v46 = vmul.f32 %v699_v63, %v1001_v8  ;;  %v745_v1 = vsub.f32 1.0, %v743_v60  ;;  %v25_v63 = vld [vmem:[%s1281_s1] sm:$0x1] }
  0x67   :  { %v512_v47 = vmul.f32 %v511_v43, %v507_v44  ;;  %v607_v49 = vrot.slane %v606_v25, 4  ;;  %v588_v22 = vadd.f32 %v587_v42, %v586_v19  ;;  %v655_v58 = vrot.slane %v654_v59, 4 }
  0x68   :  { %v746_v4 = vmax.f32 %v744_v41, 0.0  ;;  %v747_v54 = vmax.f32 %v745_v1, 0.0  ;;  %v636_v17 = vadd.f32 %v635_v56, %v634_v14  ;;  %v683_v35 = vrot.slane %v682_v9, 1 }
  0x69   :  { %833 = vrsqrt.f32 %v512_v47  ;;  %v702_v11 = vadd.f32 %v701_v46, %v700_v5  ;;  %v608_v53 = vadd.f32 %v607_v49, %v606_v25  ;;  %v656_v55 = vadd.f32 %v655_v58, %v654_v59 }
  0x6a   :  { %835 = vlog2.f32 %v588_v22  ;;  %v748_v50 = vmul.f32 %v746_v4, %v1031_v32  ;;  %v749_v21 = vmul.f32 %v747_v54, %v1036_v38  ;;  %v684_v7 = vadd.f32 %v683_v35, %v682_v9 }
  0x6b   :  { %837 = vlog2.f32 %v636_v17  ;;  %v482_v26 = vadd.f32 %v475_v0, %v1193_v23  ;;  %v483_v33 = vadd.f32 %v478_v13, %v1195_v31  ;;  %v1248_v28 = vadd.f32 %v1221_v6, %v1189_v18 }
  0x6c   :  { %v703_v24 = vrot.slane %v702_v11, 4  ;;  %v609_v30 = vrot.slane %v608_v53, 2  ;;  %vm515_vm0 = vcmp.eq.f32.partialorder %v512_v47, inf  ;;  %v518_v61 = vand.u32 2147483648, %v512_v47 }
  0x6d   :  { %v830_v16 = vpop.eup %829  ;;  %v657_v32 = vrot.slane %v656_v55, 2  ;;  %v750_v10 = vadd.f32 %v749_v21, %v748_v50  ;;  %vm517_vm1 = vcmp.eq.f32.partialorder %v512_v47, 0.0  ;;  %839 = vlog2.f32 %v684_v7 }
  0x6e   :  { %v484_v39 = vmul.f32 %v483_v33, %v482_v26  ;;  %v486_v23 = vmul.f32 %v1248_v28, %v1248_v28  ;;  %v704_v31 = vadd.f32 %v703_v24, %v702_v11  ;;  %v610_v13 = vadd.f32 %v609_v30, %v608_v53 }
  0x6f   :  { %v832_v8 = vpop.eup %831  ;;  %v751_v19 = vrot.slane %v750_v10, 4  ;;  %v658_v27 = vadd.f32 %v657_v32, %v656_v55  ;;  %v490_v5 = vsub.f32 %v26_v20, %v1053_v48  ;;  %v491_v46 = vsub.f32 %v25_v63, %v1014_v29 }
  0x70   :  { %v726_v3 = vadd.f32 %v832_v8, %v830_v16  ;;  %v487_v36 = vsub.f32 %v484_v39, %v486_v23  ;;  %v705_v43 = vrot.slane %v704_v31, 2  ;;  %v611_v40 = vrot.slane %v610_v13, 1 }
  0x71   :  { %v659_v25 = vrot.slane %v658_v27, 1  ;;  %v492_v11 = vmul.f32 %v490_v5, %v482_v26  ;;  %v494_v53 = vmul.f32 %v491_v46, %v483_v33  ;;  %v499_v16 = vsub.f32 %v1014_v29, %v25_v63 }
  0x72   :  { %v727_v44 = vrot.slane %v726_v3, 4  ;;  %v488_v60 = vadd.f32 1e-07, %v487_v36  ;;  %v706_v56 = vadd.f32 %v705_v43, %v704_v31  ;;  %v612_v58 = vadd.f32 %v611_v40, %v610_v13 }
  0x73   :  { %v834_v37 = vpop.eup %833  ;;  %v660_v4 = vadd.f32 %v659_v25, %v658_v27  ;;  %v495_v24 = vmul.f32 %v494_v53, %v491_v46  ;;  %v500_v30 = vmul.f32 %v499_v16, %v1248_v28  ;;  %v37_v28 = vld [vmem:[%s1281_s1 + $0xc] sm:$0x1] }
  0x74   :  { %v514_v38 = vmul.f32 %v834_v37, %v512_v47  ;;  %v728_v18 = vadd.f32 %v727_v44, %v726_v3  ;;  %v836_v52 = vpop.eup %835  ;;  %v707_v35 = vrot.slane %v706_v56, 1 }
  0x75   :  { %v838_v14 = vpop.eup %837  ;;  %v590_v42 = vmul.f32 0.6931472, %v836_v52 }
  0x76   :  { %v516_v0 = vsel %vm515_vm0, %v512_v47, %v514_v38  ;;  %v729_v34 = vrot.slane %v728_v18, 2  ;;  %v752_v47 = vadd.f32 %v751_v19, %v750_v10  ;;  %v638_v41 = vmul.f32 0.6931472, %v838_v14 }
  0x77   :  { %v519_v6 = vsel %vm517_vm1, %v518_v61, %v516_v0  ;;  %v840_v9 = vpop.eup %839  ;;  %v591_v22 = vadd.f32 %v590_v42, %v1048_v45  ;;  %v708_v7 = vadd.f32 %v707_v35, %v706_v56  ;;  %v493_v45 = vmul.f32 %v492_v11, %v490_v5 }
  0x78   :  { %v520_v2 = vmul.f32 4.0, %v519_v6  ;;  %v730_v15 = vadd.f32 %v729_v34, %v728_v18  ;;  %v753_v49 = vrot.slane %v752_v47, 2  ;;  %v639_v54 = vadd.f32 %v638_v41, %v1100_v57 }
  0x79   :  { %v686_v17 = vmul.f32 0.6931472, %v840_v9  ;;  %v613_v48 = vsub.f32 %v591_v22, %v612_v58  ;;  %v496_v33 = vadd.f32 %v495_v24, %v493_v45  ;;  %v501_v10 = vmul.f32 %v500_v30, %v490_v5  ;;  %v760_v9 = vld [vmem:[%s1282_s2] sm:$0x1] }
  0x7a   :  { %v521_v62 = vadd.f32 1e-07, %v520_v2  ;;  %v731_v59 = vrot.slane %v730_v15, 1  ;;  %v754_v55 = vadd.f32 %v753_v49, %v752_v47  ;;  %v661_v50 = vsub.f32 %v639_v54, %v660_v4  ;;  %v765_v2 = vld [vmem:[%s1283_s3] sm:$0x1] }
  0x7b   :  { %v687_v21 = vadd.f32 %v686_v17, %v1144_v51 }
  0x7c   :  { %841 = vrcp.f32 %v521_v62  ;;  %v732_v1 = vadd.f32 %v731_v59, %v730_v15  ;;  %v755_v37 = vrot.slane %v754_v55, 1  ;;  %v662_v61 = vadd.f32 %v661_v50, %v613_v48 }
  0x7d   :  { %v709_v32 = vsub.f32 %v687_v21, %v708_v7 }
  0x7e   :  { %843 = vlog2.f32 %v732_v1  ;;  %v756_v44 = vadd.f32 %v755_v37, %v754_v55 }
  0x7f   :  { %845 = vrcp.f32 %v488_v60  ;;  %v710_v39 = vadd.f32 %v709_v32, %v662_v61 }
  0x86   :  { %v842_v8 = vpop.eup %841 }
  0x87   :  { %v523_v3 = vmul.f32 %v842_v8, %v487_v36 }
  0x88   :  { %v844_v26 = vpop.eup %843 }
  0x89   :  { %v524_v57 = vadd.f32 1e-07, %v523_v3  ;;  %v846_v29 = vpop.eup %845  ;;  %v734_v38 = vmul.f32 0.6931472, %v844_v26 }
  0x8a   :  { %v497_v23 = vmul.f32 %v846_v29, %v496_v33  ;;  %v502_v31 = vmul.f32 %v846_v29, %v501_v10 }
  0x8b   :  { %847 = vlog2.f32 %v524_v57  ;;  %v735_v51 = vadd.f32 %v734_v38, %v1223_v12 }
  0x8c   :  { %v498_v6 = vmul.f32 0.25, %v497_v23  ;;  %v503_v13 = vmul.f32 0.5, %v502_v31 }
  0x8d   :  { %v757_v0 = vsub.f32 %v735_v51, %v756_v44 }
  0x8e   :  { %v528_v36 = vadd.f32 %v503_v13, %v498_v6 }
  0x8f   :  { %v758_v18 = vadd.f32 %v757_v0, %v710_v39 }
  0x91   :  { %v759_v19 = vmul.f32 0.25, %v758_v18 }
  0x93   :  { %v766_v34 = vmul.f32 %v759_v19, %v37_v28 }
  0x95   :  { %v848_v27 = vpop.eup %847  ;;  %v768_v12 = vadd.f32 %v766_v34, %v765_v2 }
  0x96   :  { %v526_v52 = vmul.f32 0.6931472, %v848_v27 }
  0x97   :  { %769 = vst [vmem:[%s1283_s3] sm:$0x1] %v768_v12 }
  0x98   :  { %v527_v43 = vmul.f32 0.5, %v526_v52 }
  0x9a   :  { %v529_v14 = vadd.f32 %v528_v36, %v527_v43 }
  0x9c   :  { %v530_v62 = vmax.f32 %v529_v14, 1e-07 }
  0x9e   :  { %v531_v15 = vmin.f32 %v530_v62, 100.0 }
  0xa0   :  { %v532_v63 = vsub.f32 0.0, %v531_v15 }
  0xa2   :  { %v533_v20 = vmul.f32 1.442695, %v532_v63 }
  0xa4   :  { %849 = vpow2.f32 %v533_v20 }
  0xae   :  { %v850_v40 = vpop.eup %849 }
  0xaf   :  { %v535_v47 = vsub.f32 1.0, %v850_v40 }
  0xb1   :  { %v536_v42 = vadd.f32 1e-07, %v535_v47 }
  0xb3   :  { %851 = vrsqrt.f32 %v536_v42  ;;  %vm539_vm2 = vcmp.eq.f32.partialorder %v536_v42, inf  ;;  %v542_v59 = vand.u32 2147483648, %v536_v42  ;;  %vm541_vm3 = vcmp.eq.f32.partialorder %v536_v42, 0.0 }
  0xbd   :  { %v852_v25 = vpop.eup %851 }
  0xbe   :  { %v538_v60 = vmul.f32 %v852_v25, %v536_v42 }
  0xc0   :  { %v540_v41 = vsel %vm539_vm2, %v536_v42, %v538_v60 }
  0xc1   :  { %v543_v56 = vsel %vm541_vm3, %v542_v59, %v540_v41 }
  0xc2   :  { %v761_v5 = vmul.f32 %v543_v56, %v37_v28 }
  0xc4   :  { %v763_v46 = vadd.f32 %v761_v5, %v760_v9 }
  0xc6   :  { %764 = vst [vmem:[%s1282_s2] sm:$0x1] %v763_v46 }

</bundles_post_ra>
